<compile_context>
chip_gen: v7x
topology: tpu7x:2x2x1
jax: 0.10.0
libtpu: 0.0.40
codegen_flags: <defaults>
</compile_context>

<pallas_src>
import jax
import jax.numpy as jnp
from jax.experimental import pallas as pl
from jax.experimental.pallas import tpu as pltpu


def _selector_kernel(x_ref, o_ref):
    # x_ref: (TB, TS, H) VMEM tile (only the first TS tokens were fetched),
    # o_ref: (TB, H) VMEM tile.  Identity() is a no-op; just copy token 0.
    o_ref[...] = x_ref[:, 0, :]


def _sublane_pack(dtype) -> int:
    # Minimal second-to-last block size allowed by TPU tiling for this dtype.
    itemsize = jnp.dtype(dtype).itemsize
    return max(8, 32 // itemsize)


def _choose_tb(B, TS, H, itemsize, target_bytes=4 << 20):
    # Aim for ~4 MiB per input block (double-buffered -> ~8 MiB), well under
    # the scoped VMEM limit on every generation including v7x (64 MiB phys).
    tb = max(1, target_bytes // max(1, TS * H * itemsize))
    if tb >= B:
        return B                      # full dim -> always layout-legal
    return max(8, (tb // 8) * 8)      # multiple of 8 -> aligned (TB, H) output


def selector(x):
    """Pallas equivalent of Selector.forward: returns x[:, 0]."""
    B, S, H = x.shape
    itemsize = jnp.dtype(x.dtype).itemsize

    # Smallest tiling-legal slab along the token axis that contains token 0.
    TS = min(S, _sublane_pack(x.dtype))
    TB = _choose_tb(B, TS, H, itemsize)
    grid = (pl.cdiv(B, TB),)

    cost = pl.CostEstimate(
        flops=0,
        transcendentals=0,
        bytes_accessed=int(B * TS * H * itemsize + B * H * itemsize),
    )

    return pl.pallas_call(
        _selector_kernel,
        out_shape=jax.ShapeDtypeStruct((B, H), x.dtype),
        grid=grid,
        in_specs=[
            # Only the first TS tokens of each batch tile are DMA'd.
            pl.BlockSpec((TB, TS, H), lambda i: (i, 0, 0)),
        ],
        out_specs=pl.BlockSpec((TB, H), lambda i: (i, 0)),
        compiler_params=pltpu.CompilerParams(
            # Independent batch blocks: shard across TCs on v7x megacore.
            dimension_semantics=("parallel",),
        ),
        cost_estimate=cost,
    )(x)


if __name__ == "__main__":
    # Small ViT-like token tensor: batch=2, seq=8 tokens, hidden=32.
    key = jax.random.PRNGKey(0)
    x = jax.random.normal(key, (2, 8, 32), dtype=jnp.float32)

    out = selector(x)
    jax.block_until_ready(out)

    # Reference check against plain JAX slicing (same semantics as x[:, 0]).
    ref = x[:, 0]
    assert out.shape == (2, 32), out.shape
    assert jnp.allclose(out, ref), "mismatch vs reference"

    print("KERNEL_OK")
</pallas_src>

<mosaic_0001>
module attributes {stable_mosaic.version = 11 : i64} {
  func.func @_selector_kernel(%arg0: i32, %arg1: memref<2x8x32xf32, #tpu.memory_space<vmem>>, %arg2: memref<2x32xf32, #tpu.memory_space<vmem>>) attributes {dimension_semantics = [#tpu.dimension_semantics<parallel>], iteration_bounds = array<i64: 1>, scalar_prefetch = 0 : i64, scratch_operands = 0 : i64, tpu.core_type = #tpu.core_type<tc>, window_params = [{transform_indices = @transform_0, window_bounds = array<i64: 2, 8, 32>}, {transform_indices = @transform_1, window_bounds = array<i64: 2, 32>}]} {
    %c0 = arith.constant 0 : index
    %c0_0 = arith.constant 0 : index
    %c0_1 = arith.constant 0 : index
    %0 = vector.load %arg1[%c0, %c0_0, %c0_1] : memref<2x8x32xf32, #tpu.memory_space<vmem>>, vector<2x1x32xf32>
    %1 = vector.shape_cast %0 : vector<2x1x32xf32> to vector<2x32xf32>
    %c0_2 = arith.constant 0 : index
    %c0_3 = arith.constant 0 : index
    %2 = vector.load %arg2[%c0_2, %c0_3] : memref<2x32xf32, #tpu.memory_space<vmem>>, vector<2x32xf32>
    tpu.vector_store %arg2[%c0_2, %c0_3], %1 {strides = array<i32>} : memref<2x32xf32, #tpu.memory_space<vmem>>, vector<2x32xf32>,
    return
  }
  func.func @transform_0(%arg0: i32) -> (i32, i32, i32) {
    %c0_i32 = arith.constant 0 : i32
    %c0_i32_0 = arith.constant 0 : i32
    %c0_i32_1 = arith.constant 0 : i32
    return %arg0, %c0_i32, %c0_i32_0 : i32, i32, i32
  }
  func.func @transform_1(%arg0: i32) -> (i32, i32) {
    %c0_i32 = arith.constant 0 : i32
    %c0_i32_0 = arith.constant 0 : i32
    return %arg0, %c0_i32 : i32, i32
  }
}

</mosaic_0001>

<bundles_post_ra>
// kernel: tpu_custom_call.1
= control target key start
LH: loop header
LB: loop body
LE: loop exit
PB: predicated region body
PF: predicated region fallthrough
CT: control target
= control target key end

     0   :  { %6 = vsyncpa [#allocation3], 0  ;;  %s138_s0 = inlined_call_operand.hbm [shape: f32[2,8,32], index: 0, kind: input, shape index: {}]   ;;  %s139_s1 = inlined_call_operand.hbm [shape: f32[2,32], index: 1, kind: output, shape index: {}]  }
   0x1   :  { %7 = vsyncpa [#allocation4], 0  ;;  %s100_s6 = smov [#allocation2]   ;;  %s52_s10 = scalar_lea.hbm %s138_s0, 256 }
   0x2   :  { %s13_s7 = sshll.u32 %s100_s6, 4  ;;  %p53_p0 = scmp.ne.s32.totalorder %s138_s0, %s52_s10  ;;  %s14_s7 = int_to_ptr.vmem [resolvable:$true] %s13_s7 }
   0x3   :  { %p56_p1 = scmp.lt.u32.totalorder %s52_s10, %s138_s0 }
   0x5   :  { %p58_p2 = pnand %p56_p1, %p53_p0 }
   0x7   :  { %61 = shalt.err (!%p58_p2)
}
   0x8   :  { %s62_s15 = scalar_lea.vmem %s14_s7, 256  ;;  %p67_p4 = scmp.lt.s32.totalorder %s14_s7, %s14_s7 }
   0x9   :  { %p63_p3 = scmp.ne.s32.totalorder %s14_s7, %s62_s15  ;;  %p68_p5 = scmp.lt.s32.totalorder %s62_s15, %s62_s15 }
   0xb   :  { %p69_p6 = por %p68_p5, %p67_p4 }
   0xd   :  { %p70_p7 = pnand %p69_p6, %p63_p3 }
   0xf   :  { %73 = shalt.err (!%p70_p7)
}
  0x10   :  { %s101_s16 = smov 128   ;;  %s102_s17 = smov 8  }
  0x11   :  { %19 = dma.hbm_to_vmem [thread:$0]  %s138_s0, 256, %s14_s7, [#allocation3], %s101_s16, %s101_s16, %s102_s17  }
  0x12   :  { %96 = dma.done.wait [#allocation3], 256  }
  0x13   :  { %97 = vsyncadd [#allocation3], 4294967040  ;;  %s103_s20 = smov [#allocation5]   ;;  %v23_v0 = vld [vmem:[#allocation2] sm:$0x1]  ;;  %vm28_vm0 = vcmask 1041409  }
  0x14   :  { %s39_s21 = sshll.u32 %s103_s20, 4  ;;  %v24_v1 = vld [vmem:[#allocation2 + $0x8] sm:$0x1]  ;;  %vm31_vm1 = vcmask 254976   ;;  %s40_s21 = int_to_ptr.vmem [resolvable:$true] %s39_s21 }
  0x15   :  { %v27_v2 = vrot.slane %v24_v1, 7  ;;  %s74_s22 = scalar_lea.vmem %s40_s21, 32  ;;  %p79_p9 = scmp.lt.s32.totalorder %s40_s21, %s40_s21 }
  0x16   :  { %p75_p8 = scmp.ne.s32.totalorder %s40_s21, %s74_s22  ;;  %p80_p10 = scmp.lt.s32.totalorder %s74_s22, %s74_s22 }
  0x17   :  { %v29_v3 = vsel %vm28_vm0, %v27_v2, %v23_v0 }
  0x18   :  { %32 = vst.msk [vmem:[#allocation5] sm:$0x3] %vm31_vm1, %v29_v3  ;;  %p81_p11 = por %p80_p10, %p79_p9 }
  0x1a   :  { %p82_p12 = pnand %p81_p11, %p75_p8 }
  0x1c   :  { %85 = shalt.err (!%p82_p12)
}
  0x1d   :  { %s86_s24 = scalar_lea.hbm %s139_s1, 32 }
  0x1e   :  { %p87_p13 = scmp.ne.s32.totalorder %s139_s1, %s86_s24  ;;  %p90_p0 = scmp.lt.u32.totalorder %s86_s24, %s139_s1 }
  0x20   :  { %p92_p1 = pnand %p90_p0, %p87_p13 }
  0x22   :  { %95 = shalt.err (!%p92_p1)
}
  0x23   :  { %42 = dma.vmem_to_hbm [thread:$0]  %s40_s21, 32, %s139_s1, [#allocation4]  }
  0x24   :  { %98 = dma.done.wait [#allocation4], 32  }
  0x25   :  { %99 = vsyncadd [#allocation4], 4294967264 }
  0x26   :  { %46 = vsyncpa [#allocation3], 1 }
  0x27   :  { %47 = vsyncpa [#allocation4], 1 }

</bundles_post_ra>
